<compile_context>
chip_gen: v5e
topology: v5e:2x2
jax: 0.10.0
libtpu: 0.0.40
codegen_flags: <defaults>
</compile_context>

<pallas_src>
import functools

import numpy as np
import jax
import jax.numpy as jnp
from jax.experimental import pallas as pl
from jax.experimental.pallas import tpu as pltpu

EPS = 1e-5


# ----------------------------- Pallas kernel -----------------------------------------------------

def _mix_channels(w_t, x):
    """(Cout, Cin) @ (Cin, R) -> (Cout, R) as Cin broadcast FMAs on the VPU.

    The contraction depth (Cin = 8/16) would leave the MXU systolic array ~95% idle, so the 1x1
    transposed conv is done as unrolled outer-product multiply-adds in the (C, rows) layout.
    """
    cout, cin = w_t.shape
    acc = w_t[:, 0:1] * x[0:1, :]
    for k in range(1, cin):
        acc = acc + w_t[:, k:k + 1] * x[k:k + 1, :]
    return acc


def _fused_block_kernel(xc_ref, w1t_ref, w2t_ref, g1_ref, b1_ref, g2_ref, b2_ref, mask_ref,
                        dense_ref, z1_ref, z2_ref,
                        *, total1, n_zero1, total2, n_fill2, n_zero2):
    xc = xc_ref[...]        # (Cin, Rd)  dense rows surviving the first padding crop
    mask = mask_ref[...]    # (1, Rd)    1.0 where the dense row also survives the second crop

    # ---- transconv1 (1x1, stride 2): the dense part is a pure channel mix ----------------------
    y1 = _mix_channels(w1t_ref[...], xc)                              # (Cin, Rd)

    # ---- bn1: training-mode batch stats over the dilated out1 ----------------------------------
    # zero-inserted positions contribute 0 to the sum and n_zero1 * mean^2 to the variance.
    mean1 = jnp.sum(y1, axis=1, keepdims=True) * (1.0 / total1)       # (Cin, 1)
    d1 = y1 - mean1
    var1 = (jnp.sum(d1 * d1, axis=1, keepdims=True)
            + float(n_zero1) * mean1 * mean1) * (1.0 / total1)
    inv1 = g1_ref[...] * jax.lax.rsqrt(var1 + EPS)
    shift1 = b1_ref[...] - mean1 * inv1

    # ---- relu1 ----------------------------------------------------------------------------------
    h1 = jnp.maximum(y1 * inv1 + shift1, 0.0)                         # dense rows
    h0 = jnp.maximum(shift1, 0.0)                                     # every zero-fill position

    # ---- transconv2 dense part ------------------------------------------------------------------
    y2 = _mix_channels(w2t_ref[...], h1)                              # (Cout, Rd)
    v0 = _mix_channels(w2t_ref[...], h0)                              # (Cout, 1)

    # ---- bn2: stats over the twice-dilated out2, constants folded in analytically ---------------
    mean2 = (jnp.sum(y2 * mask, axis=1, keepdims=True)
             + float(n_fill2) * v0) * (1.0 / total2)
    d2 = y2 - mean2
    dv = v0 - mean2
    var2 = (jnp.sum(d2 * d2 * mask, axis=1, keepdims=True)
            + float(n_fill2) * dv * dv
            + float(n_zero2) * mean2 * mean2) * (1.0 / total2)
    inv2 = g2_ref[...] * jax.lax.rsqrt(var2 + EPS)
    shift2 = b2_ref[...] - mean2 * inv2

    # ---- relu2 + outputs --------------------------------------------------------------------------
    dense_ref[...] = jnp.maximum(y2 * inv2 + shift2, 0.0)   # values at stage-1 dense positions
    z1_ref[...] = jnp.maximum(v0 * inv2 + shift2, 0.0)      # value at stage-1 fill positions
    z2_ref[...] = jnp.maximum(shift2, 0.0)                  # value at stage-2 zero positions


# ----------------------------- wrapper ------------------------------------------------------------

@functools.partial(jax.jit, static_argnames=("pooling1", "pooling2"))
def trans_decoupling_block_forward(x_nchw, params, pooling1, pooling2):
    x = x_nchw.astype(jnp.float32)
    n, cin, h, w = x.shape
    cout = params["w2"].shape[1]
    p1, p2 = int(pooling1), int(pooling2)

    # ---- static geometry of the two stride-2 dilations + padding crops --------------------------
    q1 = (p1 + 1) // 2                          # dense index i survives crop1 iff q1 <= i <= H-1-q1
    h1, w1 = 2 * h - 1 - 2 * p1, 2 * w - 1 - 2 * p1
    nh1, nw1 = h - 2 * q1, w - 2 * q1
    assert nh1 > 0 and nw1 > 0 and h1 > 0 and w1 > 0, "padding too large for this input"
    rd = n * nh1 * nw1                          # dense rows fed to the kernel
    total1 = n * h1 * w1                        # bn1 divisor (all elements of out1)
    n_zero1 = total1 - rd

    q2 = (p2 + 1) // 2
    h2, w2 = 2 * h1 - 1 - 2 * p2, 2 * w1 - 1 - 2 * p2
    mh, mw = h1 - 2 * q2, w1 - 2 * q2           # stage-1 grid rows/cols surviving crop2
    assert mh > 0 and mw > 0 and h2 > 0 and w2 > 0, "padding too large for this input"
    total2 = n * h2 * w2
    n_grid1 = n * mh * mw

    # stage-1 dense positions i that also survive the second crop: q2 <= 2*i - p1 <= h1-1-q2
    i_lo_h = max(q1, (q2 + p1 + 1) // 2)
    i_hi_h = min(h - 1 - q1, (h1 - 1 - q2 + p1) // 2)
    i_lo_w = max(q1, (q2 + p1 + 1) // 2)
    i_hi_w = min(w - 1 - q1, (w1 - 1 - q2 + p1) // 2)
    nh2 = max(i_hi_h - i_lo_h + 1, 0)
    nw2 = max(i_hi_w - i_lo_w + 1, 0)
    n_dense2 = n * nh2 * nw2
    n_fill2 = n_grid1 - n_dense2                # constant-v0 positions in out2
    n_zero2 = total2 - n_grid1                  # zero-inserted positions in out2

    # static 0/1 mask over the Rd dense rows: survives the second crop?
    mask_h = np.zeros((nh1,), np.float32)
    mask_w = np.zeros((nw1,), np.float32)
    if nh2 > 0:
        mask_h[i_lo_h - q1:i_hi_h - q1 + 1] = 1.0
    if nw2 > 0:
        mask_w[i_lo_w - q1:i_hi_w - q1 + 1] = 1.0
    mask = np.broadcast_to((mask_h[:, None] * mask_w[None, :])[None], (n, nh1, nw1))
    mask = jnp.asarray(mask.reshape(1, rd))

    # ---- kernel inputs in (C, rows) layout: channels on sublanes, rows on lanes ------------------
    xc = x[:, :, q1:h - q1, q1:w - q1]                       # only the rows we will ever need
    xc = jnp.transpose(xc, (1, 0, 2, 3)).reshape(cin, rd)
    w1t = jnp.transpose(params["w1"]).astype(jnp.float32)    # (out, in)
    w2t = jnp.transpose(params["w2"]).astype(jnp.float32)    # (Cout, Cin)
    g1 = params["gamma1"].reshape(cin, 1).astype(jnp.float32)
    b1 = params["beta1"].reshape(cin, 1).astype(jnp.float32)
    g2 = params["gamma2"].reshape(cout, 1).astype(jnp.float32)
    b2 = params["beta2"].reshape(cout, 1).astype(jnp.float32)

    # whole problem is VMEM-resident (a few tens of KB here) -- guard so a scaled-up call fails
    # loudly instead of silently blowing the (v7x: 64 MiB) VMEM budget.
    assert 4 * rd * (4 * cin + 4 * cout + 4) < 32 * 1024 * 1024, "input too large for fused kernel"

    vmem = pl.BlockSpec(memory_space=pltpu.MemorySpace.VMEM)
    dense, z1, z2 = pl.pallas_call(
        functools.partial(_fused_block_kernel, total1=total1, n_zero1=n_zero1,
                          total2=total2, n_fill2=n_fill2, n_zero2=n_zero2),
        out_shape=(
            jax.ShapeDtypeStruct((cout, rd), jnp.float32),   # stage-1 dense positions
            jax.ShapeDtypeStruct((cout, 1), jnp.float32),    # stage-1 fill positions
            jax.ShapeDtypeStruct((cout, 1), jnp.float32),    # stage-2 zero positions
        ),
        in_specs=[vmem] * 8,
        out_specs=(vmem, vmem, vmem),
    )(xc, w1t, w2t, g1, b1, g2, b2, mask)

    # ---- assemble the dilated NCHW output (pure data movement) ----------------------------------
    out = jnp.broadcast_to(z2.reshape(1, cout, 1, 1), (n, cout, h2, w2))
    g_lo = 2 * q2 - p2                                       # out2 index of first stage-1 position
    out = out.at[:, :,
                 g_lo:g_lo + 2 * (mh - 1) + 1:2,
                 g_lo:g_lo + 2 * (mw - 1) + 1:2].set(
        jnp.broadcast_to(z1.reshape(1, cout, 1, 1), (n, cout, mh, mw)))
    if nh2 > 0 and nw2 > 0:
        d = dense.reshape(cout, n, nh1, nw1).transpose(1, 0, 2, 3)
        d = d[:, :, i_lo_h - q1:i_hi_h - q1 + 1, i_lo_w - q1:i_hi_w - q1 + 1]
        d_lo_h = 4 * i_lo_h - 2 * p1 - p2                    # out2 index of first dense position
        d_lo_w = 4 * i_lo_w - 2 * p1 - p2
        out = out.at[:, :,
                     d_lo_h:d_lo_h + 4 * (nh2 - 1) + 1:4,
                     d_lo_w:d_lo_w + 4 * (nw2 - 1) + 1:4].set(d)
    return out


# ----------------------------- pure-JAX reference --------------------------------------------------

def _scatter_stride2(y, padding):
    """ConvTranspose2d(kernel=1, stride=2, pad=padding) spatial placement of dense results."""
    n, h, w, c = y.shape
    hf, wf = 2 * h - 1, 2 * w - 1
    full = jnp.zeros((n, hf, wf, c), y.dtype).at[:, ::2, ::2, :].set(y)
    if padding > 0:
        full = full[:, padding:hf - padding, padding:wf - padding, :]
    return full


def reference_forward(x_nchw, params, pooling1, pooling2):
    hi = jax.lax.Precision.HIGHEST
    x = jnp.transpose(x_nchw, (0, 2, 3, 1)).astype(jnp.float32)
    y1 = jnp.einsum("nhwc,cd->nhwd", x, params["w1"], precision=hi)
    out1 = _scatter_stride2(y1, pooling1)
    m1 = jnp.mean(out1, axis=(0, 1, 2))
    v1 = jnp.var(out1, axis=(0, 1, 2))
    h1 = jnp.maximum((out1 - m1) / jnp.sqrt(v1 + EPS) * params["gamma1"] + params["beta1"], 0.0)
    y2 = jnp.einsum("nhwc,cd->nhwd", h1, params["w2"], precision=hi)
    out2 = _scatter_stride2(y2, pooling2)
    m2 = jnp.mean(out2, axis=(0, 1, 2))
    v2 = jnp.var(out2, axis=(0, 1, 2))
    h2 = jnp.maximum((out2 - m2) / jnp.sqrt(v2 + EPS) * params["gamma2"] + params["beta2"], 0.0)
    return jnp.transpose(h2, (0, 3, 1, 2))


# ----------------------------- main -----------------------------------------------------------------

def _run_case(key, n, h, w, in_size, out_size, pooling1, pooling2):
    kx, kw1, kw2 = jax.random.split(key, 3)
    params = {
        # ConvTranspose2d weight is (in, out, 1, 1); with kernel=1 it is a (in, out) matrix.
        "w1": jax.random.normal(kw1, (in_size, in_size), jnp.float32) * 0.3,
        "w2": jax.random.normal(kw2, (in_size, out_size), jnp.float32) * 0.3,
        "gamma1": jnp.ones((in_size,), jnp.float32),   # BatchNorm2d default init
        "beta1": jnp.zeros((in_size,), jnp.float32),
        "gamma2": jnp.ones((out_size,), jnp.float32),
        "beta2": jnp.zeros((out_size,), jnp.float32),
    }
    x = jax.random.normal(kx, (n, in_size, h, w), jnp.float32)  # NCHW, as in PyTorch

    out = jax.block_until_ready(trans_decoupling_block_forward(x, params, pooling1, pooling2))
    ref = jax.block_until_ready(reference_forward(x, params, pooling1, pooling2))

    eh1 = 2 * h - 1 - 2 * pooling1
    ew1 = 2 * w - 1 - 2 * pooling1
    eh2 = 2 * eh1 - 1 - 2 * pooling2
    ew2 = 2 * ew1 - 1 - 2 * pooling2
    assert out.shape == (n, out_size, eh2, ew2), out.shape
    err = float(jnp.max(jnp.abs(out - ref)))
    assert jnp.allclose(out, ref, rtol=1e-3, atol=1e-3), err
    return err


if __name__ == "__main__":
    key = jax.random.PRNGKey(0)
    k1, k2 = jax.random.split(key)

    _run_case(k1, n=2, h=8, w=8, in_size=8, out_size=16, pooling1=1, pooling2=0)
    _run_case(k2, n=2, h=8, w=8, in_size=8, out_size=16, pooling1=0, pooling2=1)

    print("KERNEL_OK")
</pallas_src>

<mosaic_0001>
module attributes {stable_mosaic.version = 11 : i64} {
  func.func @_fused_block_kernel(%arg0: memref<8x72xf32, #tpu.memory_space<vmem>>, %arg1: memref<8x8xf32, #tpu.memory_space<vmem>>, %arg2: memref<16x8xf32, #tpu.memory_space<vmem>>, %arg3: memref<8x1xf32, #tpu.memory_space<vmem>>, %arg4: memref<8x1xf32, #tpu.memory_space<vmem>>, %arg5: memref<16x1xf32, #tpu.memory_space<vmem>>, %arg6: memref<16x1xf32, #tpu.memory_space<vmem>>, %arg7: memref<1x72xf32, #tpu.memory_space<vmem>>, %arg8: memref<16x72xf32, #tpu.memory_space<vmem>>, %arg9: memref<16x1xf32, #tpu.memory_space<vmem>>, %arg10: memref<16x1xf32, #tpu.memory_space<vmem>>) attributes {dimension_semantics = [], scalar_prefetch = 0 : i64, scratch_operands = 0 : i64, tpu.core_type = #tpu.core_type<tc>} {
    %c0 = arith.constant 0 : index
    %c0_0 = arith.constant 0 : index
    %0 = vector.load %arg0[%c0, %c0_0] : memref<8x72xf32, #tpu.memory_space<vmem>>, vector<8x72xf32>
    %c0_1 = arith.constant 0 : index
    %c0_2 = arith.constant 0 : index
    %1 = vector.load %arg7[%c0_1, %c0_2] : memref<1x72xf32, #tpu.memory_space<vmem>>, vector<1x72xf32>
    %c0_3 = arith.constant 0 : index
    %c0_4 = arith.constant 0 : index
    %2 = vector.load %arg1[%c0_3, %c0_4] : memref<8x8xf32, #tpu.memory_space<vmem>>, vector<8x8xf32>
    %3 = vector.extract_strided_slice %2 {offsets = [0, 0], sizes = [8, 1], strides = [1, 1]} : vector<8x8xf32> to vector<8x1xf32>
    %4 = vector.extract_strided_slice %0 {offsets = [0, 0], sizes = [1, 72], strides = [1, 1]} : vector<8x72xf32> to vector<1x72xf32>
    %5 = vector.broadcast %3 : vector<8x1xf32> to vector<8x72xf32>
    %6 = vector.broadcast %4 : vector<1x72xf32> to vector<8x72xf32>
    %7 = arith.mulf %5, %6 : vector<8x72xf32>
    %8 = vector.extract_strided_slice %2 {offsets = [0, 1], sizes = [8, 1], strides = [1, 1]} : vector<8x8xf32> to vector<8x1xf32>
    %9 = vector.extract_strided_slice %0 {offsets = [1, 0], sizes = [1, 72], strides = [1, 1]} : vector<8x72xf32> to vector<1x72xf32>
    %10 = vector.broadcast %8 : vector<8x1xf32> to vector<8x72xf32>
    %11 = vector.broadcast %9 : vector<1x72xf32> to vector<8x72xf32>
    %12 = arith.mulf %10, %11 : vector<8x72xf32>
    %13 = arith.addf %7, %12 : vector<8x72xf32>
    %14 = vector.extract_strided_slice %2 {offsets = [0, 2], sizes = [8, 1], strides = [1, 1]} : vector<8x8xf32> to vector<8x1xf32>
    %15 = vector.extract_strided_slice %0 {offsets = [2, 0], sizes = [1, 72], strides = [1, 1]} : vector<8x72xf32> to vector<1x72xf32>
    %16 = vector.broadcast %14 : vector<8x1xf32> to vector<8x72xf32>
    %17 = vector.broadcast %15 : vector<1x72xf32> to vector<8x72xf32>
    %18 = arith.mulf %16, %17 : vector<8x72xf32>
    %19 = arith.addf %13, %18 : vector<8x72xf32>
    %20 = vector.extract_strided_slice %2 {offsets = [0, 3], sizes = [8, 1], strides = [1, 1]} : vector<8x8xf32> to vector<8x1xf32>
    %21 = vector.extract_strided_slice %0 {offsets = [3, 0], sizes = [1, 72], strides = [1, 1]} : vector<8x72xf32> to vector<1x72xf32>
    %22 = vector.broadcast %20 : vector<8x1xf32> to vector<8x72xf32>
    %23 = vector.broadcast %21 : vector<1x72xf32> to vector<8x72xf32>
    %24 = arith.mulf %22, %23 : vector<8x72xf32>
    %25 = arith.addf %19, %24 : vector<8x72xf32>
    %26 = vector.extract_strided_slice %2 {offsets = [0, 4], sizes = [8, 1], strides = [1, 1]} : vector<8x8xf32> to vector<8x1xf32>
    %27 = vector.extract_strided_slice %0 {offsets = [4, 0], sizes = [1, 72], strides = [1, 1]} : vector<8x72xf32> to vector<1x72xf32>
    %28 = vector.broadcast %26 : vector<8x1xf32> to vector<8x72xf32>
    %29 = vector.broadcast %27 : vector<1x72xf32> to vector<8x72xf32>
    %30 = arith.mulf %28, %29 : vector<8x72xf32>
    %31 = arith.addf %25, %30 : vector<8x72xf32>
    %32 = vector.extract_strided_slice %2 {offsets = [0, 5], sizes = [8, 1], strides = [1, 1]} : vector<8x8xf32> to vector<8x1xf32>
    %33 = vector.extract_strided_slice %0 {offsets = [5, 0], sizes = [1, 72], strides = [1, 1]} : vector<8x72xf32> to vector<1x72xf32>
    %34 = vector.broadcast %32 : vector<8x1xf32> to vector<8x72xf32>
    %35 = vector.broadcast %33 : vector<1x72xf32> to vector<8x72xf32>
    %36 = arith.mulf %34, %35 : vector<8x72xf32>
    %37 = arith.addf %31, %36 : vector<8x72xf32>
    %38 = vector.extract_strided_slice %2 {offsets = [0, 6], sizes = [8, 1], strides = [1, 1]} : vector<8x8xf32> to vector<8x1xf32>
    %39 = vector.extract_strided_slice %0 {offsets = [6, 0], sizes = [1, 72], strides = [1, 1]} : vector<8x72xf32> to vector<1x72xf32>
    %40 = vector.broadcast %38 : vector<8x1xf32> to vector<8x72xf32>
    %41 = vector.broadcast %39 : vector<1x72xf32> to vector<8x72xf32>
    %42 = arith.mulf %40, %41 : vector<8x72xf32>
    %43 = arith.addf %37, %42 : vector<8x72xf32>
    %44 = vector.extract_strided_slice %2 {offsets = [0, 7], sizes = [8, 1], strides = [1, 1]} : vector<8x8xf32> to vector<8x1xf32>
    %45 = vector.extract_strided_slice %0 {offsets = [7, 0], sizes = [1, 72], strides = [1, 1]} : vector<8x72xf32> to vector<1x72xf32>
    %46 = vector.broadcast %44 : vector<8x1xf32> to vector<8x72xf32>
    %47 = vector.broadcast %45 : vector<1x72xf32> to vector<8x72xf32>
    %48 = arith.mulf %46, %47 : vector<8x72xf32>
    %49 = arith.addf %43, %48 : vector<8x72xf32>
    %cst = arith.constant dense<0.000000e+00> : vector<8xf32>
    %50 = vector.multi_reduction <add>, %49, %cst [1] : vector<8x72xf32> to vector<8xf32>
    %51 = vector.shape_cast %50 : vector<8xf32> to vector<8x1xf32>
    %cst_5 = arith.constant 2.958580e-03 : f32
    %52 = vector.broadcast %cst_5 : f32 to vector<8x1xf32>
    %53 = arith.mulf %51, %52 : vector<8x1xf32>
    %54 = vector.broadcast %53 : vector<8x1xf32> to vector<8x72xf32>
    %55 = arith.subf %49, %54 : vector<8x72xf32>
    %56 = arith.mulf %55, %55 : vector<8x72xf32>
    %cst_6 = arith.constant dense<0.000000e+00> : vector<8xf32>
    %57 = vector.multi_reduction <add>, %56, %cst_6 [1] : vector<8x72xf32> to vector<8xf32>
    %58 = vector.shape_cast %57 : vector<8xf32> to vector<8x1xf32>
    %cst_7 = arith.constant 2.660000e+02 : f32
    %59 = vector.broadcast %cst_7 : f32 to vector<8x1xf32>
    %60 = arith.mulf %59, %53 : vector<8x1xf32>
    %61 = arith.mulf %60, %53 : vector<8x1xf32>
    %62 = arith.addf %58, %61 : vector<8x1xf32>
    %cst_8 = arith.constant 2.958580e-03 : f32
    %63 = vector.broadcast %cst_8 : f32 to vector<8x1xf32>
    %64 = arith.mulf %62, %63 : vector<8x1xf32>
    %c0_9 = arith.constant 0 : index
    %c0_10 = arith.constant 0 : index
    %65 = vector.load %arg3[%c0_9, %c0_10] : memref<8x1xf32, #tpu.memory_space<vmem>>, vector<8x1xf32>
    %cst_11 = arith.constant 9.99999974E-6 : f32
    %66 = vector.broadcast %cst_11 : f32 to vector<8x1xf32>
    %67 = arith.addf %64, %66 : vector<8x1xf32>
    %68 = math.rsqrt %67 : vector<8x1xf32>
    %69 = arith.mulf %65, %68 : vector<8x1xf32>
    %c0_12 = arith.constant 0 : index
    %c0_13 = arith.constant 0 : index
    %70 = vector.load %arg4[%c0_12, %c0_13] : memref<8x1xf32, #tpu.memory_space<vmem>>, vector<8x1xf32>
    %71 = arith.mulf %53, %69 : vector<8x1xf32>
    %72 = arith.subf %70, %71 : vector<8x1xf32>
    %73 = vector.broadcast %69 : vector<8x1xf32> to vector<8x72xf32>
    %74 = arith.mulf %49, %73 : vector<8x72xf32>
    %75 = vector.broadcast %72 : vector<8x1xf32> to vector<8x72xf32>
    %76 = arith.addf %74, %75 : vector<8x72xf32>
    %cst_14 = arith.constant 0.000000e+00 : f32
    %77 = vector.broadcast %cst_14 : f32 to vector<8x72xf32>
    %78 = arith.maximumf %76, %77 : vector<8x72xf32>
    %cst_15 = arith.constant 0.000000e+00 : f32
    %79 = vector.broadcast %cst_15 : f32 to vector<8x1xf32>
    %80 = arith.maximumf %72, %79 : vector<8x1xf32>
    %c0_16 = arith.constant 0 : index
    %c0_17 = arith.constant 0 : index
    %81 = vector.load %arg2[%c0_16, %c0_17] : memref<16x8xf32, #tpu.memory_space<vmem>>, vector<16x8xf32>
    %82 = vector.extract_strided_slice %81 {offsets = [0, 0], sizes = [16, 1], strides = [1, 1]} : vector<16x8xf32> to vector<16x1xf32>
    %83 = vector.extract_strided_slice %78 {offsets = [0, 0], sizes = [1, 72], strides = [1, 1]} : vector<8x72xf32> to vector<1x72xf32>
    %84 = vector.broadcast %82 : vector<16x1xf32> to vector<16x72xf32>
    %85 = vector.broadcast %83 : vector<1x72xf32> to vector<16x72xf32>
    %86 = arith.mulf %84, %85 : vector<16x72xf32>
    %87 = vector.extract_strided_slice %81 {offsets = [0, 1], sizes = [16, 1], strides = [1, 1]} : vector<16x8xf32> to vector<16x1xf32>
    %88 = vector.extract_strided_slice %78 {offsets = [1, 0], sizes = [1, 72], strides = [1, 1]} : vector<8x72xf32> to vector<1x72xf32>
    %89 = vector.broadcast %87 : vector<16x1xf32> to vector<16x72xf32>
    %90 = vector.broadcast %88 : vector<1x72xf32> to vector<16x72xf32>
    %91 = arith.mulf %89, %90 : vector<16x72xf32>
    %92 = arith.addf %86, %91 : vector<16x72xf32>
    %93 = vector.extract_strided_slice %81 {offsets = [0, 2], sizes = [16, 1], strides = [1, 1]} : vector<16x8xf32> to vector<16x1xf32>
    %94 = vector.extract_strided_slice %78 {offsets = [2, 0], sizes = [1, 72], strides = [1, 1]} : vector<8x72xf32> to vector<1x72xf32>
    %95 = vector.broadcast %93 : vector<16x1xf32> to vector<16x72xf32>
    %96 = vector.broadcast %94 : vector<1x72xf32> to vector<16x72xf32>
    %97 = arith.mulf %95, %96 : vector<16x72xf32>
    %98 = arith.addf %92, %97 : vector<16x72xf32>
    %99 = vector.extract_strided_slice %81 {offsets = [0, 3], sizes = [16, 1], strides = [1, 1]} : vector<16x8xf32> to vector<16x1xf32>
    %100 = vector.extract_strided_slice %78 {offsets = [3, 0], sizes = [1, 72], strides = [1, 1]} : vector<8x72xf32> to vector<1x72xf32>
    %101 = vector.broadcast %99 : vector<16x1xf32> to vector<16x72xf32>
    %102 = vector.broadcast %100 : vector<1x72xf32> to vector<16x72xf32>
    %103 = arith.mulf %101, %102 : vector<16x72xf32>
    %104 = arith.addf %98, %103 : vector<16x72xf32>
    %105 = vector.extract_strided_slice %81 {offsets = [0, 4], sizes = [16, 1], strides = [1, 1]} : vector<16x8xf32> to vector<16x1xf32>
    %106 = vector.extract_strided_slice %78 {offsets = [4, 0], sizes = [1, 72], strides = [1, 1]} : vector<8x72xf32> to vector<1x72xf32>
    %107 = vector.broadcast %105 : vector<16x1xf32> to vector<16x72xf32>
    %108 = vector.broadcast %106 : vector<1x72xf32> to vector<16x72xf32>
    %109 = arith.mulf %107, %108 : vector<16x72xf32>
    %110 = arith.addf %104, %109 : vector<16x72xf32>
    %111 = vector.extract_strided_slice %81 {offsets = [0, 5], sizes = [16, 1], strides = [1, 1]} : vector<16x8xf32> to vector<16x1xf32>
    %112 = vector.extract_strided_slice %78 {offsets = [5, 0], sizes = [1, 72], strides = [1, 1]} : vector<8x72xf32> to vector<1x72xf32>
    %113 = vector.broadcast %111 : vector<16x1xf32> to vector<16x72xf32>
    %114 = vector.broadcast %112 : vector<1x72xf32> to vector<16x72xf32>
    %115 = arith.mulf %113, %114 : vector<16x72xf32>
    %116 = arith.addf %110, %115 : vector<16x72xf32>
    %117 = vector.extract_strided_slice %81 {offsets = [0, 6], sizes = [16, 1], strides = [1, 1]} : vector<16x8xf32> to vector<16x1xf32>
    %118 = vector.extract_strided_slice %78 {offsets = [6, 0], sizes = [1, 72], strides = [1, 1]} : vector<8x72xf32> to vector<1x72xf32>
    %119 = vector.broadcast %117 : vector<16x1xf32> to vector<16x72xf32>
    %120 = vector.broadcast %118 : vector<1x72xf32> to vector<16x72xf32>
    %121 = arith.mulf %119, %120 : vector<16x72xf32>
    %122 = arith.addf %116, %121 : vector<16x72xf32>
    %123 = vector.extract_strided_slice %81 {offsets = [0, 7], sizes = [16, 1], strides = [1, 1]} : vector<16x8xf32> to vector<16x1xf32>
    %124 = vector.extract_strided_slice %78 {offsets = [7, 0], sizes = [1, 72], strides = [1, 1]} : vector<8x72xf32> to vector<1x72xf32>
    %125 = vector.broadcast %123 : vector<16x1xf32> to vector<16x72xf32>
    %126 = vector.broadcast %124 : vector<1x72xf32> to vector<16x72xf32>
    %127 = arith.mulf %125, %126 : vector<16x72xf32>
    %128 = arith.addf %122, %127 : vector<16x72xf32>
    %c0_18 = arith.constant 0 : index
    %c0_19 = arith.constant 0 : index
    %129 = vector.load %arg2[%c0_18, %c0_19] : memref<16x8xf32, #tpu.memory_space<vmem>>, vector<16x8xf32>
    %130 = vector.extract_strided_slice %129 {offsets = [0, 0], sizes = [16, 1], strides = [1, 1]} : vector<16x8xf32> to vector<16x1xf32>
    %131 = vector.extract_strided_slice %80 {offsets = [0, 0], sizes = [1, 1], strides = [1, 1]} : vector<8x1xf32> to vector<1x1xf32>
    %132 = vector.broadcast %131 : vector<1x1xf32> to vector<16x1xf32>
    %133 = arith.mulf %130, %132 : vector<16x1xf32>
    %134 = vector.extract_strided_slice %129 {offsets = [0, 1], sizes = [16, 1], strides = [1, 1]} : vector<16x8xf32> to vector<16x1xf32>
    %135 = vector.extract_strided_slice %80 {offsets = [1, 0], sizes = [1, 1], strides = [1, 1]} : vector<8x1xf32> to vector<1x1xf32>
    %136 = vector.broadcast %135 : vector<1x1xf32> to vector<16x1xf32>
    %137 = arith.mulf %134, %136 : vector<16x1xf32>
    %138 = arith.addf %133, %137 : vector<16x1xf32>
    %139 = vector.extract_strided_slice %129 {offsets = [0, 2], sizes = [16, 1], strides = [1, 1]} : vector<16x8xf32> to vector<16x1xf32>
    %140 = vector.extract_strided_slice %80 {offsets = [2, 0], sizes = [1, 1], strides = [1, 1]} : vector<8x1xf32> to vector<1x1xf32>
    %141 = vector.broadcast %140 : vector<1x1xf32> to vector<16x1xf32>
    %142 = arith.mulf %139, %141 : vector<16x1xf32>
    %143 = arith.addf %138, %142 : vector<16x1xf32>
    %144 = vector.extract_strided_slice %129 {offsets = [0, 3], sizes = [16, 1], strides = [1, 1]} : vector<16x8xf32> to vector<16x1xf32>
    %145 = vector.extract_strided_slice %80 {offsets = [3, 0], sizes = [1, 1], strides = [1, 1]} : vector<8x1xf32> to vector<1x1xf32>
    %146 = vector.broadcast %145 : vector<1x1xf32> to vector<16x1xf32>
    %147 = arith.mulf %144, %146 : vector<16x1xf32>
    %148 = arith.addf %143, %147 : vector<16x1xf32>
    %149 = vector.extract_strided_slice %129 {offsets = [0, 4], sizes = [16, 1], strides = [1, 1]} : vector<16x8xf32> to vector<16x1xf32>
    %150 = vector.extract_strided_slice %80 {offsets = [4, 0], sizes = [1, 1], strides = [1, 1]} : vector<8x1xf32> to vector<1x1xf32>
    %151 = vector.broadcast %150 : vector<1x1xf32> to vector<16x1xf32>
    %152 = arith.mulf %149, %151 : vector<16x1xf32>
    %153 = arith.addf %148, %152 : vector<16x1xf32>
    %154 = vector.extract_strided_slice %129 {offsets = [0, 5], sizes = [16, 1], strides = [1, 1]} : vector<16x8xf32> to vector<16x1xf32>
    %155 = vector.extract_strided_slice %80 {offsets = [5, 0], sizes = [1, 1], strides = [1, 1]} : vector<8x1xf32> to vector<1x1xf32>
    %156 = vector.broadcast %155 : vector<1x1xf32> to vector<16x1xf32>
    %157 = arith.mulf %154, %156 : vector<16x1xf32>
    %158 = arith.addf %153, %157 : vector<16x1xf32>
    %159 = vector.extract_strided_slice %129 {offsets = [0, 6], sizes = [16, 1], strides = [1, 1]} : vector<16x8xf32> to vector<16x1xf32>
    %160 = vector.extract_strided_slice %80 {offsets = [6, 0], sizes = [1, 1], strides = [1, 1]} : vector<8x1xf32> to vector<1x1xf32>
    %161 = vector.broadcast %160 : vector<1x1xf32> to vector<16x1xf32>
    %162 = arith.mulf %159, %161 : vector<16x1xf32>
    %163 = arith.addf %158, %162 : vector<16x1xf32>
    %164 = vector.extract_strided_slice %129 {offsets = [0, 7], sizes = [16, 1], strides = [1, 1]} : vector<16x8xf32> to vector<16x1xf32>
    %165 = vector.extract_strided_slice %80 {offsets = [7, 0], sizes = [1, 1], strides = [1, 1]} : vector<8x1xf32> to vector<1x1xf32>
    %166 = vector.broadcast %165 : vector<1x1xf32> to vector<16x1xf32>
    %167 = arith.mulf %164, %166 : vector<16x1xf32>
    %168 = arith.addf %163, %167 : vector<16x1xf32>
    %169 = vector.broadcast %1 : vector<1x72xf32> to vector<16x72xf32>
    %170 = arith.mulf %128, %169 : vector<16x72xf32>
    %cst_20 = arith.constant dense<0.000000e+00> : vector<16xf32>
    %171 = vector.multi_reduction <add>, %170, %cst_20 [1] : vector<16x72xf32> to vector<16xf32>
    %172 = vector.shape_cast %171 : vector<16xf32> to vector<16x1xf32>
    %cst_21 = arith.constant 2.660000e+02 : f32
    %173 = vector.broadcast %cst_21 : f32 to vector<16x1xf32>
    %174 = arith.mulf %173, %168 : vector<16x1xf32>
    %175 = arith.addf %172, %174 : vector<16x1xf32>
    %cst_22 = arith.constant 8.000000e-04 : f32
    %176 = vector.broadcast %cst_22 : f32 to vector<16x1xf32>
    %177 = arith.mulf %175, %176 : vector<16x1xf32>
    %178 = vector.broadcast %177 : vector<16x1xf32> to vector<16x72xf32>
    %179 = arith.subf %128, %178 : vector<16x72xf32>
    %180 = arith.subf %168, %177 : vector<16x1xf32>
    %181 = arith.mulf %179, %179 : vector<16x72xf32>
    %182 = vector.broadcast %1 : vector<1x72xf32> to vector<16x72xf32>
    %183 = arith.mulf %181, %182 : vector<16x72xf32>
    %cst_23 = arith.constant dense<0.000000e+00> : vector<16xf32>
    %184 = vector.multi_reduction <add>, %183, %cst_23 [1] : vector<16x72xf32> to vector<16xf32>
    %185 = vector.shape_cast %184 : vector<16xf32> to vector<16x1xf32>
    %cst_24 = arith.constant 2.660000e+02 : f32
    %186 = vector.broadcast %cst_24 : f32 to vector<16x1xf32>
    %187 = arith.mulf %186, %180 : vector<16x1xf32>
    %188 = arith.mulf %187, %180 : vector<16x1xf32>
    %189 = arith.addf %185, %188 : vector<16x1xf32>
    %cst_25 = arith.constant 9.120000e+02 : f32
    %190 = vector.broadcast %cst_25 : f32 to vector<16x1xf32>
    %191 = arith.mulf %190, %177 : vector<16x1xf32>
    %192 = arith.mulf %191, %177 : vector<16x1xf32>
    %193 = arith.addf %189, %192 : vector<16x1xf32>
    %cst_26 = arith.constant 8.000000e-04 : f32
    %194 = vector.broadcast %cst_26 : f32 to vector<16x1xf32>
    %195 = arith.mulf %193, %194 : vector<16x1xf32>
    %c0_27 = arith.constant 0 : index
    %c0_28 = arith.constant 0 : index
    %196 = vector.load %arg5[%c0_27, %c0_28] : memref<16x1xf32, #tpu.memory_space<vmem>>, vector<16x1xf32>
    %cst_29 = arith.constant 9.99999974E-6 : f32
    %197 = vector.broadcast %cst_29 : f32 to vector<16x1xf32>
    %198 = arith.addf %195, %197 : vector<16x1xf32>
    %199 = math.rsqrt %198 : vector<16x1xf32>
    %200 = arith.mulf %196, %199 : vector<16x1xf32>
    %c0_30 = arith.constant 0 : index
    %c0_31 = arith.constant 0 : index
    %201 = vector.load %arg6[%c0_30, %c0_31] : memref<16x1xf32, #tpu.memory_space<vmem>>, vector<16x1xf32>
    %202 = arith.mulf %177, %200 : vector<16x1xf32>
    %203 = arith.subf %201, %202 : vector<16x1xf32>
    %204 = vector.broadcast %200 : vector<16x1xf32> to vector<16x72xf32>
    %205 = arith.mulf %128, %204 : vector<16x72xf32>
    %206 = vector.broadcast %203 : vector<16x1xf32> to vector<16x72xf32>
    %207 = arith.addf %205, %206 : vector<16x72xf32>
    %cst_32 = arith.constant 0.000000e+00 : f32
    %208 = vector.broadcast %cst_32 : f32 to vector<16x72xf32>
    %209 = arith.maximumf %207, %208 : vector<16x72xf32>
    %c0_33 = arith.constant 0 : index
    %c0_34 = arith.constant 0 : index
    %210 = vector.load %arg8[%c0_33, %c0_34] : memref<16x72xf32, #tpu.memory_space<vmem>>, vector<16x72xf32>
    tpu.vector_store %arg8[%c0_33, %c0_34], %209 {strides = array<i32>} : memref<16x72xf32, #tpu.memory_space<vmem>>, vector<16x72xf32>,
    %211 = arith.mulf %168, %200 : vector<16x1xf32>
    %212 = arith.addf %211, %203 : vector<16x1xf32>
    %cst_35 = arith.constant 0.000000e+00 : f32
    %213 = vector.broadcast %cst_35 : f32 to vector<16x1xf32>
    %214 = arith.maximumf %212, %213 : vector<16x1xf32>
    %c0_36 = arith.constant 0 : index
    %c0_37 = arith.constant 0 : index
    %215 = vector.load %arg9[%c0_36, %c0_37] : memref<16x1xf32, #tpu.memory_space<vmem>>, vector<16x1xf32>
    tpu.vector_store %arg9[%c0_36, %c0_37], %214 {strides = array<i32>} : memref<16x1xf32, #tpu.memory_space<vmem>>, vector<16x1xf32>,
    %cst_38 = arith.constant 0.000000e+00 : f32
    %216 = vector.broadcast %cst_38 : f32 to vector<16x1xf32>
    %217 = arith.maximumf %203, %216 : vector<16x1xf32>
    %c0_39 = arith.constant 0 : index
    %c0_40 = arith.constant 0 : index
    %218 = vector.load %arg10[%c0_39, %c0_40] : memref<16x1xf32, #tpu.memory_space<vmem>>, vector<16x1xf32>
    tpu.vector_store %arg10[%c0_39, %c0_40], %217 {strides = array<i32>} : memref<16x1xf32, #tpu.memory_space<vmem>>, vector<16x1xf32>,
    return
  }
}

</mosaic_0001>

<bundles_post_ra>
// kernel: trans_decoupling_block_forward.1
= control target key start
LH: loop header
LB: loop body
LE: loop exit
PB: predicated region body
PF: predicated region fallthrough
CT: control target
= control target key end

     0   :  { %v556_v0 = vmov 0   ;;  %v557_v1 = vmov 2   ;;  %v558_v3 = vmov 4   ;;  %v559_v4 = vmov 1   ;;  %s565_s22 = smov 2   ;;  %s567_s23 = smov 1   ;;  %s798_s1 = inlined_call_operand.vmem [shape: f32[8,8], index: 1, kind: input, shape index: {}]   ;;  %s799_s2 = inlined_call_operand.vmem [shape: f32[16,8], index: 2, kind: input, shape index: {}]   ;;  %s800_s0 = inlined_call_operand.vmem [shape: f32[8,72], index: 0, kind: input, shape index: {}]   ;;  %s801_s3 = inlined_call_operand.vmem [shape: f32[8,1], index: 3, kind: input, shape index: {}]   ;;  %s802_s7 = inlined_call_operand.vmem [shape: f32[1,72], index: 7, kind: input, shape index: {}]   ;;  %s803_s4 = inlined_call_operand.vmem [shape: f32[8,1], index: 4, kind: input, shape index: {}]   ;;  %s804_s5 = inlined_call_operand.vmem [shape: f32[16,1], index: 5, kind: input, shape index: {}]   ;;  %s805_s6 = inlined_call_operand.vmem [shape: f32[16,1], index: 6, kind: input, shape index: {}]   ;;  %s806_s10 = inlined_call_operand.vmem [shape: f32[16,1], index: 10, kind: output, shape index: {2}]   ;;  %s807_s9 = inlined_call_operand.vmem [shape: f32[16,1], index: 9, kind: output, shape index: {1}]   ;;  %s808_s8 = inlined_call_operand.vmem [shape: f32[16,72], index: 8, kind: output, shape index: {0}]  }
   0x1   :  { %525 = vset.pattern.permute.xlu0 %v556_v0  ;;  %527 = vset.pattern.permute.xlu1 %v557_v1  ;;  %v34_v2 = vld [vmem:[%s798_s1] sm:$0xff]  ;;  %v560_v5 = vmov 3   ;;  %v561_v6 = vmov 5   ;;  %v562_v7 = vmov 6   ;;  %v563_v8 = vmov 7   ;;  %v647_v9 = vld [vmem:[%s799_s2 + $0x8] sm:$0xff] }
   0x2   :  { %37 = vperm.xlu0 %525, %v34_v2   ;;  %50 = vperm.xlu1 %527, %v34_v2   ;;  %v32_v13 = vld [vmem:[%s800_s0] sm:$0xff]  ;;  %vm91_vm0 = vcmask 588800   ;;  %s568_s24 = smov 7   ;;  %s569_s25 = smov 3   ;;  %vm484_vm9 = vcmask 7168  }
   0x3   :  { %529 = vset.pattern.permute.xlu2 %v558_v3  ;;  %v40_v14 = vperm.slane %v32_v13, 0  ;;  %v46_v15 = vperm.slane %v32_v13, 1  ;;  %v53_v17 = vperm.slane %v32_v13, 2  ;;  %v60_v22 = vperm.slane %v32_v13, 3  ;;  %v661_v43 = vld [vmem:[%s799_s2] sm:$0xff]  ;;  %s570_s26 = smov 4  }
   0x4   :  { %64 = vperm.xlu2 %529, %v34_v2   ;;  %v67_v24 = vperm.slane %v32_v13, 4  ;;  %v74_v28 = vperm.slane %v32_v13, 5  ;;  %v81_v29 = vperm.slane %v32_v13, 6  ;;  %v88_v32 = vperm.slane %v32_v13, 7  ;;  %v105_v61 = vld [vmem:[%s801_s3] sm:$0xff]  ;;  %s564_s3 = smov 5  }
   0x5   :  { %s571_s27 = smov 127   ;;  %s572_s28 = smov 125  }
   0x6   :  { %s573_s29 = smov 126   ;;  %s574_s30 = smov 124  }
   0x7   :  { %s575_s11 = smov 122   ;;  %s576_s12 = smov 123  }
   0x8   :  { %s577_s13 = smov 121  }
   0xa   :  { %526 = vset.pattern.permute.xlu0 %v559_v4  ;;  %528 = vset.pattern.permute.xlu1 %v560_v5 }
   0xb   :  { %43 = vperm.xlu0 %526, %v34_v2   ;;  %57 = vperm.xlu1 %528, %v34_v2  }
   0xc   :  { %530 = vset.pattern.permute.xlu2 %v561_v6 }
   0xd   :  { %71 = vperm.xlu2 %530, %v34_v2  }
  0x13   :  { %531 = vset.pattern.permute.xlu1 %v562_v7  ;;  %535 = vset.pattern.permute.xlu0 %v557_v1 }
  0x14   :  { %78 = vperm.xlu1 %531, %v34_v2  }
  0x15   :  { %532 = vset.pattern.permute.xlu2 %v563_v8 }
  0x16   :  { %85 = vperm.xlu2 %532, %v34_v2  }
  0x1c   :  { %536 = vset.pattern.permute.xlu1 %v557_v1  ;;  %v118_v1 = vld [vmem:[%s803_s4] sm:$0xff]  ;;  %s566_s4 = smov 6  }
  0x1d   :  { %168 = vperm.xlu1 %536, %v647_v9  }
  0x1e   :  { %533 = vset.pattern.permute.xlu2 %v556_v0 }
  0x1f   :  { %139 = vperm.xlu2 %533, %v661_v43  }
  0x25   :  { %539 = vset.pattern.permute.xlu1 %v558_v3 }
  0x27   :  { %144 = vperm.xlu2 %533, %v647_v9  }
  0x2f   :  { %534 = vset.pattern.permute.xlu2 %v559_v4 }
  0x30   :  { %151 = vperm.xlu2 %534, %v661_v43  }
  0x38   :  { %155 = vperm.xlu2 %534, %v647_v9  }
  0x40   :  { %537 = vset.pattern.permute.xlu2 %v560_v5 }
  0x41   :  { %177 = vperm.xlu2 %537, %v661_v43  }
  0x49   :  { %181 = vperm.xlu2 %537, %v647_v9  }
  0x51   :  { %538 = vset.pattern.permute.xlu2 %v558_v3 }
  0x52   :  { %190 = vperm.xlu2 %538, %v661_v43  }
  0x5a   :  { %543 = vset.pattern.permute.xlu2 %v562_v7 }
  0x5b   :  { %220 = vperm.xlu2 %543, %v647_v9  }
  0x5e   :  { %v65_v10 = vpop.permute.xlu2 %64 }
  0x5f   :  { %v68_v30 = vmul.f32 %v67_v24, %v65_v10 }
  0x63   :  { %545 = vset.pattern.permute.xlu2 %v563_v8 }
  0x64   :  { %233 = vperm.xlu2 %545, %v647_v9  }
  0x67   :  { %v72_v16 = vpop.permute.xlu2 %71 }
  0x68   :  { %v75_v35 = vmul.f32 %v74_v28, %v72_v16 }
  0x6c   :  { %546 = vset.pattern.permute.xlu2 %v556_v0 }
  0x70   :  { %v86_v33 = vpop.permute.xlu2 %85 }
  0x71   :  { %v89_v39 = vmul.f32 %v88_v32, %v86_v33 }
  0x74   :  { %v38_v11 = vpop.permute.xlu0 %37  ;;  %v51_v12 = vpop.permute.xlu1 %50 }
  0x75   :  { %v41_v20 = vmul.f32 %v40_v14, %v38_v11  ;;  %v54_v23 = vmul.f32 %v53_v17, %v51_v12 }
  0x79   :  { %v140_v3 = vpop.permute.xlu2 %139 }
  0x7d   :  { %v44_v18 = vpop.permute.xlu0 %43  ;;  %v58_v19 = vpop.permute.xlu1 %57 }
  0x7e   :  { %v47_v21 = vmul.f32 %v46_v15, %v44_v18  ;;  %v61_v27 = vmul.f32 %v60_v22, %v58_v19 }
  0x80   :  { %v48_v25 = vadd.f32 %v47_v21, %v41_v20 }
  0x82   :  { %v55_v26 = vadd.f32 %v54_v23, %v48_v25 }
  0x84   :  { %v62_v31 = vadd.f32 %v61_v27, %v55_v26 }
  0x86   :  { %v69_v34 = vadd.f32 %v68_v30, %v62_v31  ;;  %v79_v36 = vpop.permute.xlu1 %78 }
  0x87   :  { %v82_v37 = vmul.f32 %v81_v29, %v79_v36 }
  0x88   :  { %v76_v38 = vadd.f32 %v75_v35, %v69_v34 }
  0x8a   :  { %v83_v40 = vadd.f32 %v82_v37, %v76_v38 }
  0x8c   :  { %v654_v41 = vadd.f32 %v89_v39, %v83_v40 }
  0x8e   :  { %v92_v42 = vsel %vm91_vm0, %v654_v41, 0.0 }
  0x8f   :  { %93 = vadd.xlane.f32.xlu0 %v92_v42  ;;  %v692_v49 = vpop.permute.xlu1 %168 }
  0xa3   :  { %164 = vperm.xlu0 %535, %v661_v43  }
  0xab   :  { %540 = vset.pattern.permute.xlu0 %v561_v6 }
  0xac   :  { %203 = vperm.xlu0 %540, %v661_v43  }
  0xb4   :  { %547 = vset.pattern.permute.xlu0 %v556_v0 }
 0x102   :  { %v94_v44 = vpop.xlane.xlu0 %93 }
 0x103   :  { %v95_v45 = vmul.f32 0.00295858, %v94_v44 }
 0x105   :  { %v96_v46 = vsub.f32 %v654_v41, %v95_v45  ;;  %v101_v50 = vmul.f32 266.0, %v95_v45 }
 0x107   :  { %v97_v47 = vmul.f32 %v96_v46, %v96_v46  ;;  %v102_v51 = vmul.f32 %v101_v50, %v95_v45 }
 0x109   :  { %v98_v48 = vsel %vm91_vm0, %v97_v47, 0.0 }
 0x10a   :  { %99 = vadd.xlane.f32.xlu1 %v98_v48 }
 0x115   :  { %v165_v26 = vpop.permute.xlu0 %164 }
 0x11e   :  { %v204_v48 = vpop.permute.xlu0 %203 }
 0x123   :  { %194 = vperm.xlu1 %539, %v647_v9  }
 0x12b   :  { %541 = vset.pattern.permute.xlu1 %v561_v6 }
 0x12c   :  { %207 = vperm.xlu1 %541, %v647_v9  }
 0x134   :  { %542 = vset.pattern.permute.xlu1 %v562_v7 }
 0x135   :  { %216 = vperm.xlu1 %542, %v661_v43  }
 0x13d   :  { %544 = vset.pattern.permute.xlu1 %v563_v8  ;;  %v145_v8 = vpop.permute.xlu2 %144 }
 0x13e   :  { %229 = vperm.xlu1 %544, %v661_v43  }
 0x145   :  { %v152_v13 = vpop.permute.xlu2 %151 }
 0x146   :  { %548 = vset.pattern.permute.xlu1 %v556_v0 }
 0x14d   :  { %v156_v16 = vpop.permute.xlu2 %155 }
 0x155   :  { %v178_v17 = vpop.permute.xlu2 %177 }
 0x15d   :  { %v182_v18 = vpop.permute.xlu2 %181 }
 0x165   :  { %v191_v19 = vpop.permute.xlu2 %190 }
 0x16d   :  { %v221_v20 = vpop.permute.xlu2 %220 }
 0x175   :  { %v234_v22 = vpop.permute.xlu2 %233 }
 0x17d   :  { %v100_v52 = vpop.xlane.xlu1 %99 }
 0x17e   :  { %v103_v53 = vadd.f32 %v102_v51, %v100_v52 }
 0x180   :  { %v104_v54 = vmul.f32 0.00295858, %v103_v53 }
 0x182   :  { %v106_v55 = vadd.f32 1e-05, %v104_v54 }
 0x184   :  { %550 = vrsqrt.f32 %v106_v55  ;;  %vm113_vm2 = vweird.f32 %v106_v55 }
 0x18a   :  { %v551_v56 = vpop.eup %550 }
 0x18b   :  { %v108_v57 = vmul.f32 %v551_v56, %v106_v55  ;;  %vm114_vm1 = vweird.f32 %v551_v56 }
 0x18c   :  { %vm115_vm3 = vmor %vm113_vm2, %vm114_vm1 }
 0x18d   :  { %v109_v58 = vmul.f32 %v551_v56, %v108_v57 }
 0x18f   :  { %v110_v59 = vmul.f32 0.5, %v109_v58 }
 0x191   :  { %v111_v60 = vsub.f32 1.5, %v110_v59 }
 0x193   :  { %v112_v62 = vmul.f32 %v551_v56, %v111_v60 }
 0x195   :  { %v116_v63 = vsel %vm115_vm3, %v551_v56, %v112_v62  ;;  %v195_v21 = vpop.permute.xlu1 %194 }
 0x196   :  { %v117_v0 = vmul.f32 %v116_v63, %v105_v61 }
 0x198   :  { %123 = vperm.xlu2 %546, %v117_v0   ;;  %v119_v2 = vmul.f32 %v117_v0, %v95_v45 }
 0x19a   :  { %v120_v4 = vsub.f32 %v118_v1, %v119_v2 }
 0x19c   :  { %v700_v5 = vmax.f32 %v120_v4, 0.0 }
 0x19e   :  { %v312_v6 = vperm.slane %v700_v5, 5  ;;  %v261_v7 = vperm.slane %v700_v5, 2  ;;  %v329_v10 = vperm.slane %v700_v5, 6  ;;  %v244_v11 = vperm.slane %v700_v5, 1  ;;  %v208_v23 = vpop.permute.xlu1 %207 }
 0x19f   :  { %v346_v12 = vperm.slane %v700_v5, 7  ;;  %v278_v14 = vperm.slane %v700_v5, 3  ;;  %v295_v15 = vperm.slane %v700_v5, 4 }
 0x1a0   :  { %129 = vperm.xlu2 %546, %v120_v4   ;;  %314 = vrot.lane.b32.xlu0 %v312_v6, %s564_s3 }
 0x1a1   :  { %263 = vrot.lane.b32.xlu1 %v261_v7, %s565_s22 }
 0x1a7   :  { %v217_v25 = vpop.permute.xlu1 %216 }
 0x1a8   :  { %331 = vrot.lane.b32.xlu0 %v329_v10, %s566_s4  ;;  %246 = vrot.lane.b32.xlu2 %v244_v11, %s567_s23 }
 0x1a9   :  { %348 = vrot.lane.b32.xlu1 %v346_v12, %s568_s24 }
 0x1b0   :  { %280 = vrot.lane.b32.xlu2 %v278_v14, %s569_s25  ;;  %v230_v31 = vpop.permute.xlu1 %229 }
 0x1b8   :  { %297 = vrot.lane.b32.xlu2 %v295_v15, %s570_s26 }
 0x1f2   :  { %v124_v24 = vpop.permute.xlu2 %123 }
 0x1f3   :  { %v126_v27 = vmul.f32 %v124_v24, %v654_v41 }
 0x1fa   :  { %v130_v28 = vpop.permute.xlu2 %129 }
 0x1fb   :  { %v132_v29 = vadd.f32 %v130_v28, %v126_v27 }
 0x1fd   :  { %v133_v30 = vmax.f32 %v132_v29, 0.0 }
 0x1ff   :  { %v236_v32 = vperm.slane %v133_v30, 7  ;;  %v147_v33 = vperm.slane %v133_v30, 0  ;;  %v158_v34 = vperm.slane %v133_v30, 1  ;;  %v171_v35 = vperm.slane %v133_v30, 2 }
 0x200   :  { %v210_v36 = vperm.slane %v133_v30, 5  ;;  %v223_v37 = vperm.slane %v133_v30, 6  ;;  %v184_v47 = vperm.slane %v133_v30, 3  ;;  %v197_v51 = vperm.slane %v133_v30, 4 }
 0x201   :  { %v238_v38 = vmul.f32 %v236_v32, %v234_v22  ;;  %v237_v39 = vmul.f32 %v236_v32, %v230_v31  ;;  %v148_v40 = vmul.f32 %v147_v33, %v140_v3  ;;  %v149_v42 = vmul.f32 %v147_v33, %v145_v8  ;;  %v549_v31 = vld [vmem:[%s802_s7] ss:$0 sm:$0xff] }
 0x202   :  { %v159_v44 = vmul.f32 %v158_v34, %v152_v13  ;;  %v160_v45 = vmul.f32 %v158_v34, %v156_v16  ;;  %v172_v46 = vmul.f32 %v171_v35, %v165_v26  ;;  %v247_v41 = vpop.permute.xlu2 %246  ;;  %v173_v50 = vmul.f32 %v171_v35, %v692_v49 }
 0x203   :  { %v212_v54 = vmul.f32 %v210_v36, %v208_v23  ;;  %v224_v55 = vmul.f32 %v223_v37, %v217_v25  ;;  %v225_v56 = vmul.f32 %v223_v37, %v221_v20  ;;  %v211_v57 = vmul.f32 %v210_v36, %v204_v48 }
 0x204   :  { %v161_v52 = vadd.f32 %v159_v44, %v148_v40  ;;  %v162_v53 = vadd.f32 %v160_v45, %v149_v42  ;;  %v249_v58 = vmul.f32 %v247_v41, %v661_v43  ;;  %v250_v59 = vmul.f32 %v247_v41, %v647_v9 }
 0x205   :  { %v185_v62 = vmul.f32 %v184_v47, %v178_v17  ;;  %v186_v63 = vmul.f32 %v184_v47, %v182_v18  ;;  %v198_v1 = vmul.f32 %v197_v51, %v191_v19  ;;  %v199_v2 = vmul.f32 %v197_v51, %v195_v21 }
 0x206   :  { %v174_v60 = vadd.f32 %v172_v46, %v161_v52  ;;  %v175_v61 = vadd.f32 %v173_v50, %v162_v53  ;;  %255 = vrot.lane.b32.xlu0 %v250_v59, %s571_s27  ;;  %253 = vrot.lane.b32.xlu2 %v249_v58, %s571_s27  ;;  %v241_v40 = vperm.slane %v700_v5, 0 }
 0x208   :  { %v187_v0 = vadd.f32 %v185_v62, %v174_v60  ;;  %v188_v49 = vadd.f32 %v186_v63, %v175_v61  ;;  %v242_v45 = vmul.f32 %v241_v40, %v661_v43  ;;  %v243_v41 = vmul.f32 %v241_v40, %v647_v9 }
 0x20a   :  { %v200_v3 = vadd.f32 %v198_v1, %v187_v0  ;;  %v201_v4 = vadd.f32 %v199_v2, %v188_v49  ;;  %v281_v6 = vpop.permute.xlu2 %280 }
 0x20b   :  { %v283_v7 = vmul.f32 %v281_v6, %v661_v43  ;;  %v284_v23 = vmul.f32 %v281_v6, %v647_v9 }
 0x20c   :  { %v214_v8 = vadd.f32 %v212_v54, %v201_v4  ;;  %v213_v10 = vadd.f32 %v211_v57, %v200_v3 }
 0x20e   :  { %v227_v11 = vadd.f32 %v225_v56, %v214_v8  ;;  %v226_v12 = vadd.f32 %v224_v55, %v213_v10  ;;  %287 = vrot.lane.b32.xlu0 %v283_v7, %s572_s28 }
 0x210   :  { %v714_v13 = vadd.f32 %v237_v39, %v226_v12  ;;  %v716_v14 = vadd.f32 %v238_v38, %v227_v11 }
 0x212   :  { %v298_v15 = vpop.permute.xlu2 %297  ;;  %v315_v16 = vpop.permute.xlu0 %314  ;;  %v367_v32 = vmul.f32 %v549_v31, %v716_v14  ;;  %v366_v33 = vmul.f32 %v549_v31, %v714_v13 }
 0x213   :  { %v301_v17 = vmul.f32 %v298_v15, %v647_v9  ;;  %v264_v18 = vpop.permute.xlu1 %263  ;;  %v300_v24 = vmul.f32 %v298_v15, %v661_v43  ;;  %v317_v26 = vmul.f32 %v315_v16, %v661_v43  ;;  %v318_v27 = vmul.f32 %v315_v16, %v647_v9 }
 0x214   :  { %v266_v19 = vmul.f32 %v264_v18, %v661_v43  ;;  %v267_v20 = vmul.f32 %v264_v18, %v647_v9  ;;  %v371_v34 = vsel %vm91_vm0, %v367_v32, 0.0  ;;  %v368_v35 = vsel %vm91_vm0, %v366_v33, 0.0 }
 0x216   :  { %272 = vrot.lane.b32.xlu2 %v267_v20, %s573_s29  ;;  %270 = vrot.lane.b32.xlu1 %v266_v19, %s573_s29 }
 0x217   :  { %306 = vrot.lane.b32.xlu0 %v301_v17, %s574_s30 }
 0x21a   :  { %v332_v21 = vpop.permute.xlu0 %331 }
 0x21b   :  { %v334_v22 = vmul.f32 %v332_v21, %v661_v43  ;;  %v349_v25 = vpop.permute.xlu1 %348  ;;  %v335_v30 = vmul.f32 %v332_v21, %v647_v9 }
 0x21c   :  { %v352_v28 = vmul.f32 %v349_v25, %v647_v9  ;;  %v351_v29 = vmul.f32 %v349_v25, %v661_v43 }
 0x21e   :  { %304 = vrot.lane.b32.xlu2 %v300_v24, %s574_s30  ;;  %289 = vrot.lane.b32.xlu1 %v284_v23, %s572_s28 }
 0x21f   :  { %338 = vrot.lane.b32.xlu0 %v334_v22, %s575_s11 }
 0x226   :  { %323 = vrot.lane.b32.xlu2 %v318_v27, %s576_s12  ;;  %321 = vrot.lane.b32.xlu1 %v317_v26, %s576_s12 }
 0x227   :  { %357 = vrot.lane.b32.xlu0 %v352_v28, %s577_s13 }
 0x22e   :  { %355 = vrot.lane.b32.xlu2 %v351_v29, %s577_s13  ;;  %340 = vrot.lane.b32.xlu1 %v335_v30, %s575_s11 }
 0x257   :  { %372 = vadd.xlane.f32.xlu2 %v371_v34 }
 0x258   :  { %369 = vadd.xlane.f32.xlu1 %v368_v35 }
 0x260   :  { %v254_v36 = vpop.permute.xlu2 %253 }
 0x261   :  { %v259_v47 = vadd.f32 %v254_v36, %v242_v45 }
 0x270   :  { %v273_v39 = vpop.permute.xlu2 %272 }
 0x278   :  { %v256_v37 = vpop.permute.xlu0 %255  ;;  %v305_v46 = vpop.permute.xlu2 %304 }
 0x279   :  { %v260_v51 = vadd.f32 %v256_v37, %v243_v41 }
 0x27b   :  { %v277_v55 = vadd.f32 %v273_v39, %v260_v51 }
 0x280   :  { %v288_v42 = vpop.permute.xlu0 %287  ;;  %v324_v54 = vpop.permute.xlu2 %323 }
 0x288   :  { %v271_v38 = vpop.permute.xlu1 %270  ;;  %v356_v62 = vpop.permute.xlu2 %355 }
 0x289   :  { %v276_v48 = vadd.f32 %v271_v38, %v259_v47  ;;  %v307_v50 = vpop.permute.xlu0 %306 }
 0x28b   :  { %v293_v52 = vadd.f32 %v288_v42, %v276_v48 }
 0x28d   :  { %v310_v56 = vadd.f32 %v305_v46, %v293_v52  ;;  %v418_v52 = vld [vmem:[%s804_s5] sm:$0xff] }
 0x290   :  { %v290_v44 = vpop.permute.xlu1 %289 }
 0x291   :  { %v294_v57 = vadd.f32 %v290_v44, %v277_v55  ;;  %v339_v59 = vpop.permute.xlu0 %338 }
 0x293   :  { %v311_v5 = vadd.f32 %v307_v50, %v294_v57 }
 0x295   :  { %v328_v63 = vadd.f32 %v324_v54, %v311_v5 }
 0x298   :  { %v322_v53 = vpop.permute.xlu1 %321 }
 0x299   :  { %v327_v58 = vadd.f32 %v322_v53, %v310_v56  ;;  %v358_v49 = vpop.permute.xlu0 %357 }
 0x29b   :  { %v344_v60 = vadd.f32 %v339_v59, %v327_v58  ;;  %v444_v58 = vld [vmem:[%s805_s6] sm:$0xff] }
 0x29d   :  { %v739_v43 = vadd.f32 %v356_v62, %v344_v60  ;;  %v419_v62 = vld [vmem:[%s804_s5 + $0x8] sm:$0xff] }
 0x29f   :  { %v374_v9 = vmul.f32 266.0, %v739_v43 }
 0x2a0   :  { %v341_v61 = vpop.permute.xlu1 %340 }
 0x2a1   :  { %v345_v0 = vadd.f32 %v341_v61, %v328_v63 }
 0x2a3   :  { %v742_v2 = vadd.f32 %v358_v49, %v345_v0 }
 0x2a5   :  { %v375_v7 = vmul.f32 266.0, %v742_v2 }
 0x2ca   :  { %v373_v6 = vpop.xlane.xlu2 %372 }
 0x2cb   :  { %v370_v1 = vpop.xlane.xlu1 %369  ;;  %v377_v8 = vadd.f32 %v375_v7, %v373_v6 }
 0x2cc   :  { %v376_v3 = vadd.f32 %v374_v9, %v370_v1 }
 0x2cd   :  { %v745_v10 = vmul.f32 0.0008, %v377_v8 }
 0x2ce   :  { %v378_v4 = vmul.f32 0.0008, %v376_v3 }
 0x2cf   :  { %v393_v27 = vsub.f32 %v742_v2, %v745_v10  ;;  %v411_v35 = vmul.f32 912.0, %v745_v10 }
 0x2d0   :  { %382 = vperm.xlu0 %547, %v378_v4   ;;  %v392_v23 = vsub.f32 %v739_v43, %v378_v4  ;;  %v410_v25 = vmul.f32 912.0, %v378_v4 }
 0x2d1   :  { %v405_v33 = vmul.f32 266.0, %v393_v27  ;;  %v413_v38 = vmul.f32 %v411_v35, %v745_v10 }
 0x2d2   :  { %v404_v24 = vmul.f32 266.0, %v392_v23  ;;  %v412_v29 = vmul.f32 %v410_v25, %v378_v4 }
 0x2d3   :  { %v407_v36 = vmul.f32 %v405_v33, %v393_v27 }
 0x2d4   :  { %v406_v26 = vmul.f32 %v404_v24, %v392_v23 }
 0x2d8   :  { %387 = vperm.xlu0 %547, %v745_v10  }
 0x342   :  { %v383_v11 = vpop.permute.xlu0 %382 }
 0x343   :  { %v390_v12 = vsub.f32 %v714_v13, %v383_v11 }
 0x345   :  { %v394_v15 = vmul.f32 %v390_v12, %v390_v12 }
 0x347   :  { %v396_v16 = vmul.f32 %v549_v31, %v394_v15 }
 0x349   :  { %v398_v17 = vsel %vm91_vm0, %v396_v16, 0.0 }
 0x34a   :  { %399 = vadd.xlane.f32.xlu0 %v398_v17  ;;  %v388_v18 = vpop.permute.xlu0 %387 }
 0x34b   :  { %v391_v19 = vsub.f32 %v716_v14, %v388_v18 }
 0x34d   :  { %v395_v20 = vmul.f32 %v391_v19, %v391_v19 }
 0x34f   :  { %v397_v21 = vmul.f32 %v549_v31, %v395_v20 }
 0x351   :  { %v401_v22 = vsel %vm91_vm0, %v397_v21, 0.0 }
 0x352   :  { %402 = vadd.xlane.f32.xlu1 %v401_v22 }
 0x3bd   :  { %v400_v28 = vpop.xlane.xlu0 %399 }
 0x3be   :  { %v408_v30 = vadd.f32 %v406_v26, %v400_v28 }
 0x3c0   :  { %v414_v32 = vadd.f32 %v412_v29, %v408_v30 }
 0x3c2   :  { %v416_v34 = vmul.f32 0.0008, %v414_v32 }
 0x3c4   :  { %v420_v31 = vadd.f32 1e-05, %v416_v34 }
 0x3c5   :  { %v403_v37 = vpop.xlane.xlu1 %402 }
 0x3c6   :  { %552 = vrsqrt.f32 %v420_v31  ;;  %v409_v39 = vadd.f32 %v407_v36, %v403_v37  ;;  %vm428_vm5 = vweird.f32 %v420_v31 }
 0x3c8   :  { %v415_v40 = vadd.f32 %v413_v38, %v409_v39 }
 0x3ca   :  { %v417_v42 = vmul.f32 0.0008, %v415_v40 }
 0x3cc   :  { %v553_v44 = vpop.eup %552  ;;  %v421_v45 = vadd.f32 1e-05, %v417_v42 }
 0x3cd   :  { %v423_v46 = vmul.f32 %v553_v44, %v420_v31  ;;  %vm429_vm4 = vweird.f32 %v553_v44 }
 0x3ce   :  { %554 = vrsqrt.f32 %v421_v45  ;;  %vm430_vm6 = vmor %vm428_vm5, %vm429_vm4  ;;  %vm438_vm8 = vweird.f32 %v421_v45 }
 0x3cf   :  { %v424_v47 = vmul.f32 %v553_v44, %v423_v46 }
 0x3d1   :  { %v425_v48 = vmul.f32 0.5, %v424_v47 }
 0x3d3   :  { %v426_v41 = vsub.f32 1.5, %v425_v48 }
 0x3d4   :  { %v555_v50 = vpop.eup %554 }
 0x3d5   :  { %v433_v51 = vmul.f32 %v555_v50, %v421_v45  ;;  %v427_v53 = vmul.f32 %v553_v44, %v426_v41  ;;  %vm439_vm7 = vweird.f32 %v555_v50 }
 0x3d6   :  { %vm440_vm10 = vmor %vm438_vm8, %vm439_vm7 }
 0x3d7   :  { %v434_v54 = vmul.f32 %v555_v50, %v433_v51  ;;  %v431_v55 = vsel %vm430_vm6, %v553_v44, %v427_v53 }
 0x3d8   :  { %v442_v56 = vmul.f32 %v431_v55, %v418_v52 }
 0x3d9   :  { %v435_v57 = vmul.f32 0.5, %v434_v54 }
 0x3da   :  { %452 = vperm.xlu2 %546, %v442_v56   ;;  %v446_v59 = vmul.f32 %v442_v56, %v378_v4  ;;  %v478_v60 = vmul.f32 %v442_v56, %v739_v43  ;;  %v445_v43 = vld [vmem:[%s805_s6 + $0x8] sm:$0xff] }
 0x3db   :  { %v436_v5 = vsub.f32 1.5, %v435_v57 }
 0x3dc   :  { %v448_v61 = vsub.f32 %v444_v58, %v446_v59 }
 0x3dd   :  { %v437_v63 = vmul.f32 %v555_v50, %v436_v5 }
 0x3de   :  { %v480_v0 = vadd.f32 %v478_v60, %v448_v61  ;;  %v487_v9 = vmax.f32 %v448_v61, 0.0 }
 0x3df   :  { %v441_v49 = vsel %vm440_vm10, %v555_v50, %v437_v63 }
 0x3e0   :  { %v443_v1 = vmul.f32 %v441_v49, %v419_v62  ;;  %v482_v3 = vmax.f32 %v480_v0, 0.0  ;;  %489 = vst.msk [vmem:[%s806_s10] sm:$0xff] %vm484_vm9, %v487_v9 }
 0x3e2   :  { %457 = vperm.xlu1 %548, %v443_v1   ;;  %464 = vperm.xlu2 %546, %v448_v61   ;;  %485 = vst.msk [vmem:[%s807_s9] sm:$0xff] %vm484_vm9, %v482_v3  ;;  %v447_v4 = vmul.f32 %v443_v1, %v745_v10  ;;  %v479_v6 = vmul.f32 %v443_v1, %v742_v2 }
 0x3e4   :  { %v449_v7 = vsub.f32 %v445_v43, %v447_v4 }
 0x3e6   :  { %469 = vperm.xlu0 %547, %v449_v7   ;;  %v481_v8 = vadd.f32 %v479_v6, %v449_v7  ;;  %v488_v11 = vmax.f32 %v449_v7, 0.0 }
 0x3e8   :  { %v483_v12 = vmax.f32 %v481_v8, 0.0  ;;  %490 = vst.msk [vmem:[%s806_s10 + $0x8] sm:$0xff] %vm484_vm9, %v488_v11 }
 0x3ea   :  { %486 = vst.msk [vmem:[%s807_s9 + $0x8] sm:$0xff] %vm484_vm9, %v483_v12 }
 0x434   :  { %v453_v15 = vpop.permute.xlu2 %452 }
 0x435   :  { %v460_v10 = vmul.f32 %v453_v15, %v714_v13 }
 0x43c   :  { %v465_v16 = vpop.permute.xlu2 %464 }
 0x43d   :  { %v472_v2 = vadd.f32 %v465_v16, %v460_v10 }
 0x43f   :  { %v474_v17 = vmax.f32 %v472_v2, 0.0 }
 0x441   :  { %476 = vst.msk [vmem:[%s808_s8] sm:$0xff] %vm91_vm0, %v474_v17 }
 0x454   :  { %v458_v18 = vpop.permute.xlu1 %457 }
 0x455   :  { %v461_v19 = vmul.f32 %v458_v18, %v716_v14 }
 0x458   :  { %v470_v20 = vpop.permute.xlu0 %469 }
 0x459   :  { %v473_v21 = vadd.f32 %v470_v20, %v461_v19 }
 0x45b   :  { %v475_v22 = vmax.f32 %v473_v21, 0.0 }
 0x45d   :  { %477 = vst.msk [vmem:[%s808_s8 + $0x8] sm:$0xff] %vm91_vm0, %v475_v22 }

</bundles_post_ra>
